<compile_context>
chip_gen: v7x
topology: tpu7x:2x2x1
jax: 0.10.0
libtpu: 0.0.40
codegen_flags: <defaults>
</compile_context>

<pallas_src>
import functools

import jax
import jax.numpy as jnp
from jax.experimental import pallas as pl
from jax.experimental.pallas import tpu as pltpu


def _round_up(x, m):
    return ((x + m - 1) // m) * m


def _valuefn_kernel(x_ref, w1_ref, b1_ref, w2_ref, b2_ref, w3_ref, b3_ref, o_ref):
    # x_ref: (TILE_B, dim) in the compute dtype (f32 or bf16).
    # w*_ref: resident weights (constant index_map).  Biases are f32.
    x = x_ref[...]                                                       # (B, D)

    h1 = jnp.dot(x, w1_ref[...], preferred_element_type=jnp.float32)    # (B, H1) f32
    h1 = jnp.maximum(h1 + b1_ref[...], 0.0)                             # bias+ReLU in f32
    h1 = h1.astype(w2_ref.dtype)                                        # back to MXU dtype

    h2 = jnp.dot(h1, w2_ref[...], preferred_element_type=jnp.float32)   # (B, H2) f32
    h2 = jnp.maximum(h2 + b2_ref[...], 0.0)

    # Final Linear(H2 -> 1): lane reduction instead of an N=1 MXU matmul.
    # w3_ref is a (1, H2) row; note bias fold into the matmuls (concat [x|1])
    # was skipped as a negligible micro-opt for these tiny hidden sizes.
    w3_row = w3_ref[...].astype(jnp.float32)                            # (1, H2)
    out = jnp.sum(h2 * w3_row, axis=-1, keepdims=True)                  # (B, 1) f32
    o_ref[...] = (out + b3_ref[...]).astype(o_ref.dtype)


@functools.partial(jax.jit, static_argnames=("tile_b", "compute_dtype"))
def value_fn_forward(obs, params, *, tile_b=1024, compute_dtype=jnp.float32):
    """obs: (batch, dim) float32.  Returns (batch, 1) float32.

    params: dict with w1 (dim,H1), b1 (1,H1), w2 (H1,H2), b2 (1,H2),
            w3 (H2,1), b3 (1,1), all float32.
    """
    batch, dim = obs.shape

    # Effective tile: multiple of 16 (covers f32 sublane=8 and bf16 packing=16),
    # capped at the (rounded) batch so tiny batches stay a single grid step.
    tb = min(int(tile_b), _round_up(batch, 16))
    tb = _round_up(tb, 16)
    padded = _round_up(batch, tb)
    if padded != batch:
        obs = jnp.pad(obs, ((0, padded - batch), (0, 0)))

    # Cast matmul operands to the compute dtype (bf16 on v6e/v7x halves HBM
    # traffic for obs and hits the fast MXU path); biases stay f32.
    obs_c = obs.astype(compute_dtype)
    w1 = params["w1"].astype(compute_dtype)
    w2 = params["w2"].astype(compute_dtype)
    w3_row = params["w3"].reshape(1, -1).astype(compute_dtype)   # (1, H2)
    b1 = params["b1"].astype(jnp.float32)
    b2 = params["b2"].astype(jnp.float32)
    b3 = params["b3"].astype(jnp.float32)

    grid = (padded // tb,)

    out = pl.pallas_call(
        _valuefn_kernel,
        out_shape=jax.ShapeDtypeStruct((padded, 1), jnp.float32),
        grid_spec=pltpu.PrefetchScalarGridSpec(
            num_scalar_prefetch=0,
            grid=grid,
            in_specs=[
                pl.BlockSpec((tb, dim), lambda i: (i, 0)),        # obs tile (pipelined)
                pl.BlockSpec(w1.shape, lambda i: (0, 0)),         # weights: resident
                pl.BlockSpec(b1.shape, lambda i: (0, 0)),
                pl.BlockSpec(w2.shape, lambda i: (0, 0)),
                pl.BlockSpec(b2.shape, lambda i: (0, 0)),
                pl.BlockSpec(w3_row.shape, lambda i: (0, 0)),
                pl.BlockSpec(b3.shape, lambda i: (0, 0)),
            ],
            out_specs=pl.BlockSpec((tb, 1), lambda i: (i, 0)),
        ),
        compiler_params=pltpu.CompilerParams(
            dimension_semantics=("parallel",),                    # shard batch across TCs (v7x)
        ),
    )(obs_c, w1, b1, w2, b2, w3_row, b3)

    return out[:batch]


def init_value_fn_params(key, dim, hidden_dims=(32, 32)):
    """Deterministic init mimicking nn.Linear's U(-1/sqrt(fan_in), 1/sqrt(fan_in))."""
    sizes = [dim] + list(hidden_dims) + [1]
    params = {}
    for i in range(len(sizes) - 1):
        fan_in, fan_out = sizes[i], sizes[i + 1]
        key, kw, kb = jax.random.split(key, 3)
        bound = 1.0 / jnp.sqrt(jnp.float32(fan_in))
        # Stored as (in, out) so the kernel does x @ W (PyTorch stores (out, in)).
        params[f"w{i+1}"] = jax.random.uniform(
            kw, (fan_in, fan_out), jnp.float32, minval=-bound, maxval=bound)
        params[f"b{i+1}"] = jax.random.uniform(
            kb, (1, fan_out), jnp.float32, minval=-bound, maxval=bound)
    return params


def value_fn_reference(obs, params):
    """Plain-JAX reference for correctness checking."""
    h = jnp.maximum(obs @ params["w1"] + params["b1"], 0.0)
    h = jnp.maximum(h @ params["w2"] + params["b2"], 0.0)
    return h @ params["w3"] + params["b3"]


if __name__ == "__main__":
    key = jax.random.PRNGKey(0)
    k_obs, k_obs2, k_params = jax.random.split(key, 3)

    dim = 16
    params = init_value_fn_params(k_params, dim, hidden_dims=(32, 32))

    # --- small batch, f32 path (exact semantics of the PyTorch module) ---
    batch = 8
    obs = jax.random.normal(k_obs, (batch, dim), dtype=jnp.float32)
    out = jax.block_until_ready(value_fn_forward(obs, params))
    ref = value_fn_reference(obs, params)
    assert out.shape == (batch, 1)
    assert jnp.allclose(out, ref, atol=1e-5, rtol=1e-5)

    # --- non-divisible batch, multi-step grid, f32 path (exercises padding) ---
    batch2 = 300
    obs2 = jax.random.normal(k_obs2, (batch2, dim), dtype=jnp.float32)
    out2 = jax.block_until_ready(value_fn_forward(obs2, params, tile_b=128))
    ref2 = value_fn_reference(obs2, params)
    assert out2.shape == (batch2, 1)
    assert jnp.allclose(out2, ref2, atol=1e-5, rtol=1e-5)

    # --- bf16 compute path (v6e/v7x fast path), f32 accumulation ---
    out_bf16 = jax.block_until_ready(
        value_fn_forward(obs2, params, tile_b=128, compute_dtype=jnp.bfloat16))
    assert out_bf16.shape == (batch2, 1)
    assert jnp.allclose(out_bf16, ref2, atol=5e-2, rtol=5e-2)

    print("KERNEL_OK")
</pallas_src>

<mosaic_0001>
module attributes {stable_mosaic.version = 11 : i64} {
  func.func @_valuefn_kernel(%arg0: i32, %arg1: memref<16x16xf32, #tpu.memory_space<vmem>>, %arg2: memref<16x32xf32, #tpu.memory_space<vmem>>, %arg3: memref<1x32xf32, #tpu.memory_space<vmem>>, %arg4: memref<32x32xf32, #tpu.memory_space<vmem>>, %arg5: memref<1x32xf32, #tpu.memory_space<vmem>>, %arg6: memref<1x32xf32, #tpu.memory_space<vmem>>, %arg7: memref<1x1xf32, #tpu.memory_space<vmem>>, %arg8: memref<16x1xf32, #tpu.memory_space<vmem>>) attributes {dimension_semantics = [#tpu.dimension_semantics<parallel>], iteration_bounds = array<i64: 1>, scalar_prefetch = 0 : i64, scratch_operands = 0 : i64, tpu.core_type = #tpu.core_type<tc>, window_params = [{transform_indices = @transform_0, window_bounds = array<i64: 16, 16>}, {pipeline_mode = #tpu.pipeline_mode<synchronous>, transform_indices = @transform_1, window_bounds = array<i64: 16, 32>}, {pipeline_mode = #tpu.pipeline_mode<synchronous>, transform_indices = @transform_2, window_bounds = array<i64: 1, 32>}, {pipeline_mode = #tpu.pipeline_mode<synchronous>, transform_indices = @transform_3, window_bounds = array<i64: 32, 32>}, {pipeline_mode = #tpu.pipeline_mode<synchronous>, transform_indices = @transform_4, window_bounds = array<i64: 1, 32>}, {pipeline_mode = #tpu.pipeline_mode<synchronous>, transform_indices = @transform_5, window_bounds = array<i64: 1, 32>}, {pipeline_mode = #tpu.pipeline_mode<synchronous>, transform_indices = @transform_6, window_bounds = array<i64: 1, 1>}, {transform_indices = @transform_7, window_bounds = array<i64: 16, 1>}]} {
    %c0 = arith.constant 0 : index
    %c0_0 = arith.constant 0 : index
    %0 = vector.load %arg1[%c0, %c0_0] : memref<16x16xf32, #tpu.memory_space<vmem>>, vector<16x16xf32>
    %c0_1 = arith.constant 0 : index
    %c0_2 = arith.constant 0 : index
    %1 = vector.load %arg2[%c0_1, %c0_2] : memref<16x32xf32, #tpu.memory_space<vmem>>, vector<16x32xf32>
    %cst = arith.constant dense<0.000000e+00> : vector<16x32xf32>
    %2 = tpu.matmul %0, %1, %cst {dimension_numbers = #tpu.dot_dimension_numbers<[1], [0], [0], [1], [0, 0, 1, 1], [], []>} : vector<16x16xf32>, vector<16x32xf32>, vector<16x32xf32> -> vector<16x32xf32>
    %c0_3 = arith.constant 0 : index
    %c0_4 = arith.constant 0 : index
    %3 = vector.load %arg3[%c0_3, %c0_4] : memref<1x32xf32, #tpu.memory_space<vmem>>, vector<1x32xf32>
    %4 = vector.broadcast %3 : vector<1x32xf32> to vector<16x32xf32>
    %5 = arith.addf %2, %4 : vector<16x32xf32>
    %cst_5 = arith.constant 0.000000e+00 : f32
    %6 = vector.broadcast %cst_5 : f32 to vector<16x32xf32>
    %7 = arith.maximumf %5, %6 : vector<16x32xf32>
    %c0_6 = arith.constant 0 : index
    %c0_7 = arith.constant 0 : index
    %8 = vector.load %arg4[%c0_6, %c0_7] : memref<32x32xf32, #tpu.memory_space<vmem>>, vector<32x32xf32>
    %cst_8 = arith.constant dense<0.000000e+00> : vector<16x32xf32>
    %9 = tpu.matmul %7, %8, %cst_8 {dimension_numbers = #tpu.dot_dimension_numbers<[1], [0], [0], [1], [0, 0, 1, 1], [], []>} : vector<16x32xf32>, vector<32x32xf32>, vector<16x32xf32> -> vector<16x32xf32>
    %c0_9 = arith.constant 0 : index
    %c0_10 = arith.constant 0 : index
    %10 = vector.load %arg5[%c0_9, %c0_10] : memref<1x32xf32, #tpu.memory_space<vmem>>, vector<1x32xf32>
    %11 = vector.broadcast %10 : vector<1x32xf32> to vector<16x32xf32>
    %12 = arith.addf %9, %11 : vector<16x32xf32>
    %cst_11 = arith.constant 0.000000e+00 : f32
    %13 = vector.broadcast %cst_11 : f32 to vector<16x32xf32>
    %14 = arith.maximumf %12, %13 : vector<16x32xf32>
    %c0_12 = arith.constant 0 : index
    %c0_13 = arith.constant 0 : index
    %15 = vector.load %arg6[%c0_12, %c0_13] : memref<1x32xf32, #tpu.memory_space<vmem>>, vector<1x32xf32>
    %16 = vector.broadcast %15 : vector<1x32xf32> to vector<16x32xf32>
    %17 = arith.mulf %14, %16 : vector<16x32xf32>
    %cst_14 = arith.constant dense<0.000000e+00> : vector<16xf32>
    %18 = vector.multi_reduction <add>, %17, %cst_14 [1] : vector<16x32xf32> to vector<16xf32>
    %19 = vector.shape_cast %18 : vector<16xf32> to vector<16x1xf32>
    %c0_15 = arith.constant 0 : index
    %c0_16 = arith.constant 0 : index
    %20 = vector.load %arg7[%c0_15, %c0_16] : memref<1x1xf32, #tpu.memory_space<vmem>>, vector<1x1xf32>
    %21 = vector.broadcast %20 : vector<1x1xf32> to vector<16x1xf32>
    %22 = arith.addf %19, %21 : vector<16x1xf32>
    %c0_17 = arith.constant 0 : index
    %c0_18 = arith.constant 0 : index
    %23 = vector.load %arg8[%c0_17, %c0_18] : memref<16x1xf32, #tpu.memory_space<vmem>>, vector<16x1xf32>
    tpu.vector_store %arg8[%c0_17, %c0_18], %22 {strides = array<i32>} : memref<16x1xf32, #tpu.memory_space<vmem>>, vector<16x1xf32>,
    return
  }
  func.func @transform_0(%arg0: i32) -> (i32, i32) {
    %c0_i32 = arith.constant 0 : i32
    %c0_i32_0 = arith.constant 0 : i32
    return %arg0, %c0_i32 : i32, i32
  }
  func.func @transform_1(%arg0: i32) -> (i32, i32) {
    %c0_i32 = arith.constant 0 : i32
    %c0_i32_0 = arith.constant 0 : i32
    %c0_i32_1 = arith.constant 0 : i32
    return %c0_i32, %c0_i32_0 : i32, i32
  }
  func.func @transform_2(%arg0: i32) -> (i32, i32) {
    %c0_i32 = arith.constant 0 : i32
    %c0_i32_0 = arith.constant 0 : i32
    %c0_i32_1 = arith.constant 0 : i32
    return %c0_i32, %c0_i32_0 : i32, i32
  }
  func.func @transform_3(%arg0: i32) -> (i32, i32) {
    %c0_i32 = arith.constant 0 : i32
    %c0_i32_0 = arith.constant 0 : i32
    %c0_i32_1 = arith.constant 0 : i32
    return %c0_i32, %c0_i32_0 : i32, i32
  }
  func.func @transform_4(%arg0: i32) -> (i32, i32) {
    %c0_i32 = arith.constant 0 : i32
    %c0_i32_0 = arith.constant 0 : i32
    %c0_i32_1 = arith.constant 0 : i32
    return %c0_i32, %c0_i32_0 : i32, i32
  }
  func.func @transform_5(%arg0: i32) -> (i32, i32) {
    %c0_i32 = arith.constant 0 : i32
    %c0_i32_0 = arith.constant 0 : i32
    %c0_i32_1 = arith.constant 0 : i32
    return %c0_i32, %c0_i32_0 : i32, i32
  }
  func.func @transform_6(%arg0: i32) -> (i32, i32) {
    %c0_i32 = arith.constant 0 : i32
    %c0_i32_0 = arith.constant 0 : i32
    %c0_i32_1 = arith.constant 0 : i32
    return %c0_i32, %c0_i32_0 : i32, i32
  }
  func.func @transform_7(%arg0: i32) -> (i32, i32) {
    %c0_i32 = arith.constant 0 : i32
    %c0_i32_0 = arith.constant 0 : i32
    return %arg0, %c0_i32 : i32, i32
  }
}

</mosaic_0001>

<bundles_post_ra>
// kernel: value_fn_forward.1
= control target key start
LH: loop header
LB: loop body
LE: loop exit
PB: predicated region body
PF: predicated region fallthrough
CT: control target
= control target key end

     0   :  { %s434_s0 = inlined_call_operand.vmem [shape: f32[16,16], index: 0, kind: input, shape index: {}]   ;;  %s435_s1 = inlined_call_operand.hbm [shape: f32[16,32], index: 1, kind: input, shape index: {}]   ;;  %s436_s2 = inlined_call_operand.vmem [shape: f32[1,32], index: 2, kind: input, shape index: {}]   ;;  %s437_s3 = inlined_call_operand.vmem [shape: f32[32,32], index: 3, kind: input, shape index: {}]   ;;  %s438_s4 = inlined_call_operand.vmem [shape: f32[1,32], index: 4, kind: input, shape index: {}]   ;;  %s439_s5 = inlined_call_operand.vmem [shape: f32[1,32], index: 5, kind: input, shape index: {}]   ;;  %s440_s6 = inlined_call_operand.<no memory space> [shape: f32[1,1], index: 6, kind: input, shape index: {}]   ;;  %s441_s7 = inlined_call_operand.vmem [shape: f32[16,1], index: 7, kind: output, shape index: {}]  }
   0x1   :  { %v12_v0 = vstv %s440_s6 }
   0x2   :  { %13 = vst [vmem:[#allocation2] sm:$0x1] %v12_v0 }
   0x3   :  { %14 = vsyncpa [#allocation4], 0  ;;  %s339_s26 = smov [#allocation3]   ;;  %s315_s30 = scalar_lea.hbm %s435_s1, 256 }
   0x4   :  { %s22_s27 = sshll.u32 %s339_s26, 4  ;;  %p316_p0 = scmp.ne.s32.totalorder %s435_s1, %s315_s30  ;;  %s23_s27 = int_to_ptr.vmem [resolvable:$true] %s22_s27 }
   0x5   :  { %p319_p1 = scmp.lt.u32.totalorder %s315_s30, %s435_s1 }
   0x7   :  { %p321_p2 = pnand %p319_p1, %p316_p0 }
   0x9   :  { %324 = shalt.err (!%p321_p2)
}
   0xa   :  { %s325_s6 = scalar_lea.vmem %s23_s27, 256  ;;  %p330_p4 = scmp.lt.s32.totalorder %s23_s27, %s23_s27 }
   0xb   :  { %p326_p3 = scmp.ne.s32.totalorder %s23_s27, %s325_s6  ;;  %p331_p5 = scmp.lt.s32.totalorder %s325_s6, %s325_s6 }
   0xd   :  { %p332_p6 = por %p331_p5, %p330_p4 }
   0xf   :  { %p333_p7 = pnand %p332_p6, %p326_p3 }
  0x11   :  { %336 = shalt.err (!%p333_p7)
}
  0x12   :  { %s340_s12 = smov 128   ;;  %s341_s13 = smov 8  }
  0x13   :  { %28 = dma.hbm_to_vmem [thread:$0]  %s435_s1, 256, %s23_s27, [#allocation4], %s340_s12, %s340_s12, %s341_s13  }
  0x14   :  { %337 = dma.done.wait [#allocation4], 256  }
  0x15   :  { %338 = vsyncadd [#allocation4], 4294967040  ;;  %vm53_vm0 = vcmask 130048   ;;  %v44_v1 = vld [vmem:[#allocation3] sm:$0xff]  ;;  %v45_v2 = vld [vmem:[#allocation3 + $0x8] sm:$0xff]  ;;  %vm148_vm1 = vcmask 261120  }
  0x16   :  { %v42_v3 = vld [vmem:[%s434_s0] sm:$0xff]  ;;  %v300_v4 = vpack.c.bf16 %v45_v2, %v44_v1  ;;  %v138_v6 = vld [vmem:[%s437_s3 + $0x8] sm:$0xff]  ;;  %v139_v9 = vld [vmem:[%s437_s3 + $0x10] sm:$0xff]  ;;  %vm256_vm2 = vcmask 7168  }
  0x17   :  { %286 = vmatprep.mubr.msk.f32.mxu0 %vm53_vm0, %v42_v3  ;;  %v137_v5 = vld [vmem:[%s437_s3] sm:$0xff]  ;;  %v43_v8 = vld [vmem:[%s434_s0 + $0x8] sm:$0xff]  ;;  %v140_v10 = vld [vmem:[%s437_s3 + $0x18] sm:$0xff] }
  0x18   :  { %v304_v7 = vpack.c.bf16 %v138_v6, %v137_v5  ;;  %301 = vmatprep.subr.bf16.mxu0 %v300_v4  ;;  %v308_v11 = vpack.c.bf16 %v140_v10, %v139_v9  ;;  %v264_v12 = vld [vmem:[%s436_s2] ss:$0 sm:$0xff] }
  0x19   :  { %303 = vmatpush3.bf16.msra.mxu0 %v300_v4  ;;  %v267_v19 = vld [vmem:[%s438_s4] ss:$0 sm:$0xff] }
  0x1a   :  { %305 = vmatprep.subr.bf16.mxu1 %v304_v7  ;;  %v270_v24 = vld [vmem:[%s439_s5] ss:$0 sm:$0xff] }
  0x1b   :  { %307 = vmatpush3.bf16.msra.mxu1 %v304_v7  ;;  %v271_v31 = vld [vmem:[#allocation2] ss:$0 sm:$0xff] }
  0x1c   :  { %287 = vmatmul.mubr.msk.f32.vlgmr.msra.gmra.mrb[0].mxu0 %vm53_vm0, %v43_v8  ;;  %309 = vmatprep.subr.bf16.mxu1 %v308_v11 }
  0x1f   :  { %311 = vmatpush3.bf16.msra.mxu1 %v308_v11 }
  0xef   :  { %v288_v13 = vpop.f32.mrb[0].mxu0 }
  0xf0   :  { %v132_v14 = vadd.f32 %v288_v13, %v264_v12  ;;  %v126_v15 = vpop.f32.mrb[1].mxu0 }
  0xf1   :  { %v127_v16 = vadd.f32 %v264_v12, %v126_v15 }
  0xf2   :  { %v136_v18 = vmax.f32 %v132_v14, 0.0 }
  0xf3   :  { %v135_v17 = vmax.f32 %v127_v16, 0.0 }
  0xf5   :  { %297 = vmatprep.mubr.msk.f32.mxu1 %vm148_vm1, %v135_v17 }
  0xf6   :  { %298 = vmatmul.mubr.msk.f32.vlgmr.msra.gmra.mrb[0].mxu1 %vm148_vm1, %v136_v18 }
 0x1c9   :  { %v299_v20 = vpop.f32.mrb[0].mxu1 }
 0x1ca   :  { %v227_v21 = vadd.f32 %v299_v20, %v267_v19  ;;  %v221_v22 = vpop.f32.mrb[1].mxu1 }
 0x1cb   :  { %v222_v23 = vadd.f32 %v267_v19, %v221_v22 }
 0x1cc   :  { %v231_v25 = vmax.f32 %v227_v21, 0.0 }
 0x1cd   :  { %v230_v26 = vmax.f32 %v222_v23, 0.0 }
 0x1ce   :  { %v240_v29 = vmul.f32 %v270_v24, %v231_v25 }
 0x1cf   :  { %v239_v27 = vmul.f32 %v270_v24, %v230_v26 }
 0x1d0   :  { %v244_v30 = vsel %vm148_vm1, %v240_v29, 0.0 }
 0x1d1   :  { %v241_v28 = vsel %vm148_vm1, %v239_v27, 0.0 }
 0x1d2   :  { %242 = vadd.xlane.f32.xlu0 %v241_v28 }
 0x1d6   :  { %245 = vadd.xlane.f32.xlu0 %v244_v30 }
 0x25f   :  { %v243_v32 = vpop.xlane.xlu0 %242 }
 0x260   :  { %v254_v33 = vadd.f32 %v271_v31, %v243_v32 }
 0x262   :  { %257 = vst.msk [vmem:[%s441_s7] sm:$0xff] %vm256_vm2, %v254_v33 }
 0x263   :  { %v246_v34 = vpop.xlane.xlu0 %245 }
 0x264   :  { %v255_v35 = vadd.f32 %v271_v31, %v246_v34 }
 0x266   :  { %258 = vst.msk [vmem:[%s441_s7 + $0x8] sm:$0xff] %vm256_vm2, %v255_v35 }
 0x267   :  { %263 = vsyncpa [#allocation4], 1 }

</bundles_post_ra>
